<compile_context>
chip_gen: v6e
topology: v6e:2x2x1
jax: 0.10.0
libtpu: 0.0.40
codegen_flags: <defaults>
</compile_context>

<pallas_src>
import jax
import jax.numpy as jnp
from jax.experimental import pallas as pl
from jax.experimental.pallas import tpu as pltpu


_SQRT_2_OVER_PI = 0.7978845608028654
_VMEM_CACHE = None


def _vmem_limits():
    """Returns (buffer_sizing_budget, vmem_limit_bytes), generation-aware."""
    global _VMEM_CACHE
    if _VMEM_CACHE is None:
        phys = None
        try:
            phys = getattr(pltpu.get_tpu_info(), "vmem_capacity_bytes", None)
        except Exception:
            phys = None
        if not phys or phys <= 0:
            phys = 64 * 1024 * 1024          # conservative: v7x per-core VMEM
        vmem_limit = int(phys * 0.80)        # stay clearly under the physical cap
        budget = int(vmem_limit * 0.85)      # headroom for Mosaic internal scratch
        _VMEM_CACHE = (budget, vmem_limit)
    return _VMEM_CACHE


def _gelu_tanh(g):
    # ttnn.gelu defaults to the fast/approximate (tanh) gelu; tanh lowers to the
    # EUP transcendental slot, so it overlaps with MXU/VPU work.
    return 0.5 * g * (1.0 + jnp.tanh(_SQRT_2_OVER_PI * (g + 0.044715 * g * g * g)))


# ----------------------------- kernels --------------------------------------


def _geglu_kernel_resident(x_ref, w_ref, b_ref, o_ref):
    """Whole concatenated [K, 2N] weight resident in VMEM; one matmul."""
    hg = jnp.dot(x_ref[...], w_ref[...], preferred_element_type=jnp.float32)
    hg = hg + b_ref[...]
    n = o_ref.shape[-1]
    o_ref[...] = (hg[:, :n] * _gelu_tanh(hg[:, n:])).astype(o_ref.dtype)


def _geglu_kernel_nsplit(x_ref, wh_ref, wg_ref, bh_ref, bg_ref, o_ref):
    """Weights streamed in N-strips with the full K per strip: no accumulators."""
    x = x_ref[...]
    h = jnp.dot(x, wh_ref[...], preferred_element_type=jnp.float32) + bh_ref[...]
    g = jnp.dot(x, wg_ref[...], preferred_element_type=jnp.float32) + bg_ref[...]
    o_ref[...] = (h * _gelu_tanh(g)).astype(o_ref.dtype)


def _geglu_kernel_kacc(x_ref, wh_ref, wg_ref, bh_ref, bg_ref, o_ref, acc_h, acc_g):
    """K-reduction fallback: f32 accumulators, bias folded into the k==0 init."""
    k = pl.program_id(2)

    @pl.when(k == 0)
    def _():
        acc_h[...] = jnp.broadcast_to(bh_ref[...], acc_h.shape)
        acc_g[...] = jnp.broadcast_to(bg_ref[...], acc_g.shape)

    x = x_ref[...]
    acc_h[...] += jnp.dot(x, wh_ref[...], preferred_element_type=jnp.float32)
    acc_g[...] += jnp.dot(x, wg_ref[...], preferred_element_type=jnp.float32)

    @pl.when(k == pl.num_programs(2) - 1)
    def _():
        o_ref[...] = (acc_h[...] * _gelu_tanh(acc_g[...])).astype(o_ref.dtype)


# ----------------------------- helpers --------------------------------------


def _round_up(x, m):
    return ((x + m - 1) // m) * m


def _pad2d(a, rows, cols):
    r, c = a.shape
    if r == rows and c == cols:
        return a
    return jnp.pad(a, ((0, rows - r), (0, cols - c)))


def _pick_tm(M):
    # Largest row tile that still leaves >=4 grid steps (>=2 per v7x TensorCore),
    # relaxing to >=2 and then >=1 steps for small M.
    for min_tiles in (4, 2, 1):
        for cand in (512, 256, 128, 64, 32, 16, 8):
            if M >= min_tiles * cand:
                return cand
    return 8


def _cost_estimate(m, k, n, xb, wb, ob):
    # Two [m,k]x[k,n] matmuls, one tanh per gate element.
    return pl.CostEstimate(
        flops=4 * m * k * n,
        transcendentals=m * n,
        bytes_accessed=m * k * xb + 2 * k * n * wb + 2 * n * 4 + m * n * ob,
    )


# ----------------------------- dispatcher ------------------------------------


def geglu_matmul(x2d, w_p, b_p, n_out, *, vmem_budget=None, vmem_limit=None):
    """x2d: [M, K<=K_pad]; w_p: [K_pad, 2*N_pad] = [Wh | Wg]; b_p: [1, 2*N_pad] f32."""
    M, K = x2d.shape
    K_pad, twoN = w_p.shape
    N_pad = twoN // 2
    assert twoN == 2 * N_pad and K <= K_pad and 0 < n_out <= N_pad
    assert K_pad % 256 == 0 and N_pad % 256 == 0 and b_p.shape == (1, twoN)

    budget0, limit0 = _vmem_limits()
    budget = budget0 if vmem_budget is None else vmem_budget
    limit = limit0 if vmem_limit is None else vmem_limit

    out_dtype = x2d.dtype
    xb = jnp.dtype(x2d.dtype).itemsize
    wb = jnp.dtype(w_p.dtype).itemsize
    bb = jnp.dtype(b_p.dtype).itemsize
    ob = jnp.dtype(out_dtype).itemsize

    # ---------- Path 1: weights fully VMEM-resident (single-buffered) ----------
    tm0 = _pick_tm(M)
    tm_cands = []
    for t in (tm0, 256, 128, 64, 32, 16, 8):
        if t <= tm0 and t not in tm_cands:
            tm_cands.append(t)

    for tm in tm_cands:
        need = (2 * tm * K_pad * xb          # x tile, double-buffered
                + K_pad * twoN * wb          # W, single buffer (constant block)
                + 8 * twoN * bb              # bias (sublane-padded), single buffer
                + 2 * tm * N_pad * ob        # out tile, double-buffered
                + tm * twoN * 4              # f32 x@W intermediate
                + tm * N_pad * 4)            # f32 epilogue temp
        if need > budget:
            continue
        M_pad = _round_up(M, tm)
        x_p = _pad2d(x2d, M_pad, K_pad)
        out = pl.pallas_call(
            _geglu_kernel_resident,
            out_shape=jax.ShapeDtypeStruct((M_pad, N_pad), out_dtype),
            grid_spec=pltpu.PrefetchScalarGridSpec(
                num_scalar_prefetch=0,
                grid=(M_pad // tm,),
                in_specs=[
                    pl.BlockSpec((tm, K_pad), lambda i: (i, 0)),          # x
                    pl.BlockSpec((K_pad, twoN), lambda i: (0, 0),         # W resident
                                 pipeline_mode=pl.Buffered(1)),
                    pl.BlockSpec((1, twoN), lambda i: (0, 0),             # bias
                                 pipeline_mode=pl.Buffered(1)),
                ],
                out_specs=pl.BlockSpec((tm, N_pad), lambda i: (i, 0)),
            ),
            compiler_params=pltpu.CompilerParams(
                dimension_semantics=("parallel",),
                vmem_limit_bytes=limit),
            cost_estimate=_cost_estimate(M_pad, K_pad, N_pad, xb, wb, ob),
        )(x_p, w_p, b_p)
        if M_pad == M and N_pad == n_out:
            return out
        return out[:M, :n_out]

    # ---------- Path 2: tiled fallback (weight strips streamed from HBM) ------
    tm_limit = max(8, _round_up(min(M, 1024), 8))
    tm_cands = [t for t in (1024, 512, 256, 128, 64, 32, 16, 8) if t <= tm_limit] or [8]
    tn_cands = [t for t in (512, 256) if N_pad % t == 0] or [256]
    tk_cands = [t for t in range(K_pad, 255, -256) if K_pad % t == 0] or [K_pad]

    def tiled_need(tm_c, tn_c, tk_c):
        return (2 * tm_c * tk_c * xb          # x tile, double-buffered
                + 2 * 2 * tk_c * tn_c * wb    # Wh & Wg strips, double-buffered
                + 2 * 2 * 8 * tn_c * bb       # bias strips (sublane-padded)
                + 2 * tm_c * tn_c * ob        # out tile, double-buffered
                + 2 * tm_c * tn_c * 4         # f32 accumulators
                + 2 * tm_c * tn_c * 4)        # f32 dot / epilogue temps

    choice = None
    for tm in tm_cands:                       # maximize tm: weight traffic ~ M/tm
        for tn in tn_cands:
            for tk in tk_cands:               # prefer full K -> no accumulators
                if tiled_need(tm, tn, tk) <= budget:
                    choice = (tm, tn, tk)
                    break
            if choice:
                break
        if choice:
            break
    if choice is None:
        # Last-resort floor: keep MXU-friendly 256-wide K/N tiles; bump limit.
        choice = (min(256, tm_limit), 256, 256)
        limit = max(limit, int(tiled_need(*choice) * 1.2) + (4 << 20))

    tm, tn, tk = choice
    M_pad = _round_up(M, tm)
    x_p = _pad2d(x2d, M_pad, K_pad)
    n_blocks = N_pad // tn
    k_steps = K_pad // tk
    grid = (M_pad // tm, n_blocks, k_steps)

    in_specs = [
        pl.BlockSpec((tm, tk), lambda i, j, k: (i, k)),                  # x
        pl.BlockSpec((tk, tn), lambda i, j, k: (k, j)),                  # Wh strip
        pl.BlockSpec((tk, tn), lambda i, j, k: (k, j + n_blocks)),       # Wg strip
        pl.BlockSpec((1, tn), lambda i, j, k: (0, j)),                   # bh strip
        pl.BlockSpec((1, tn), lambda i, j, k: (0, j + n_blocks)),        # bg strip
    ]
    out_spec = pl.BlockSpec((tm, tn), lambda i, j, k: (i, j))

    if k_steps == 1:
        kernel, scratch = _geglu_kernel_nsplit, []
    else:
        kernel = _geglu_kernel_kacc
        scratch = [pltpu.VMEM((tm, tn), jnp.float32),
                   pltpu.VMEM((tm, tn), jnp.float32)]

    out = pl.pallas_call(
        kernel,
        out_shape=jax.ShapeDtypeStruct((M_pad, N_pad), out_dtype),
        grid_spec=pltpu.PrefetchScalarGridSpec(
            num_scalar_prefetch=0,
            grid=grid,
            in_specs=in_specs,
            out_specs=out_spec,
            scratch_shapes=scratch),
        compiler_params=pltpu.CompilerParams(
            dimension_semantics=("parallel", "parallel", "arbitrary"),
            vmem_limit_bytes=limit),
        cost_estimate=_cost_estimate(M_pad, K_pad, N_pad, xb, wb, ob),
    )(x_p, w_p, w_p, b_p, b_p)
    if M_pad == M and N_pad == n_out:
        return out
    return out[:M, :n_out]


# ----------------------------- module ----------------------------------------


class TtGEGLU:
    """JAX/Pallas port of the TT GEGLU block.

    Parameters (deterministic, synthetic; mirrors the PyTorch state dict):
      proj.weight : [2*inner_dim, dim]   (nn.Linear convention)
      proj.bias   : [2*inner_dim]
    Weights are transposed, split into hidden/gate halves, zero-padded to
    256-aligned [K_pad, 2*N_pad] and concatenated ONCE here (not per call).
    """

    # TODO(synk): ttnn sharded memory configs / matmul program & compute configs
    # have no direct Pallas equivalent; sharding is expressed via BlockSpec tiling.

    def __init__(self, dim, inner_dim, key, weights_dtype=jnp.bfloat16):
        kw, kb = jax.random.split(key)
        w = jax.random.normal(kw, (2 * inner_dim, dim), jnp.float32) * 0.02
        b = jax.random.normal(kb, (2 * inner_dim,), jnp.float32) * 0.02

        wt = w.T                                   # [dim, 2*inner]; first half = hidden
        K_pad = _round_up(dim, 256)                # 256-aligned for v6e/v7x 256x256 MXU
        N_pad = _round_up(inner_dim, 256)
        wh_p = _pad2d(wt[:, :inner_dim], K_pad, N_pad)
        wg_p = _pad2d(wt[:, inner_dim:], K_pad, N_pad)
        self.w_p = jnp.concatenate([wh_p, wg_p], axis=1).astype(weights_dtype)  # [K_pad, 2*N_pad]

        bh_p = jnp.pad(b[:inner_dim], (0, N_pad - inner_dim))
        bg_p = jnp.pad(b[inner_dim:], (0, N_pad - inner_dim))
        self.b_p = jnp.concatenate([bh_p, bg_p])[None, :].astype(jnp.float32)   # [1, 2*N_pad]

        self.dim = dim
        self.inner_dim = inner_dim
        self.K_pad = K_pad
        self.N_pad = N_pad

    def __call__(self, input_tensor):
        # input_tensor: [1, 1, S, D]  (ttnn 4-D linear layout)
        b0, b1, S, D = input_tensor.shape
        assert D == self.dim
        x2d = input_tensor.reshape(b0 * b1 * S, D)
        out2d = geglu_matmul(x2d, self.w_p, self.b_p, self.inner_dim)
        return out2d.reshape(b0, b1, S, self.inner_dim)


# ----------------------------- tests ------------------------------------------


if __name__ == "__main__":
    key = jax.random.PRNGKey(0)
    k_in, k_p1, k_in2, k_p2, k_in3, k_p3 = jax.random.split(key, 6)

    def reference(x, mod):
        b0, b1, S, D = x.shape
        xf = x.reshape(-1, D).astype(jnp.float32)
        n, Np = mod.inner_dim, mod.N_pad
        wh = mod.w_p[:D, :n].astype(jnp.float32)
        wg = mod.w_p[:D, Np:Np + n].astype(jnp.float32)
        bh = mod.b_p[:, :n]
        bg = mod.b_p[:, Np:Np + n]
        h = xf @ wh + bh
        g = xf @ wg + bg
        return (h * jax.nn.gelu(g, approximate=True)).reshape(b0, b1, S, n)

    # 1) aligned shapes -> resident-weight fast path (grid over M only).
    S, D, INNER = 256, 128, 256
    x = jax.random.normal(k_in, (1, 1, S, D), jnp.float32).astype(jnp.bfloat16)
    mod = TtGEGLU(dim=D, inner_dim=INNER, key=k_p1, weights_dtype=jnp.bfloat16)
    out = jax.block_until_ready(mod(x))
    ref = reference(x, mod)
    assert out.shape == (1, 1, S, INNER)
    assert jnp.allclose(out.astype(jnp.float32), ref, atol=2e-2, rtol=2e-2)

    # 2) unaligned shapes -> exercises the zero-pad / slice robustness path.
    S2, D2, INNER2 = 200, 96, 160
    x2 = jax.random.normal(k_in2, (1, 1, S2, D2), jnp.float32).astype(jnp.bfloat16)
    mod2 = TtGEGLU(dim=D2, inner_dim=INNER2, key=k_p2, weights_dtype=jnp.bfloat16)
    out2 = jax.block_until_ready(mod2(x2))
    ref2 = reference(x2, mod2)
    assert out2.shape == (1, 1, S2, INNER2)
    assert jnp.allclose(out2.astype(jnp.float32), ref2, atol=2e-2, rtol=2e-2)

    # 3) tiny budget -> tiled path with single K step (no-accumulator variant).
    out3 = jax.block_until_ready(
        geglu_matmul(x.reshape(S, D), mod.w_p, mod.b_p, mod.inner_dim,
                     vmem_budget=64 * 1024)
    )
    assert jnp.allclose(out3.astype(jnp.float32), ref.reshape(S, INNER),
                        atol=2e-2, rtol=2e-2)

    # 4) larger K + tight budget -> tiled path with K-reduction accumulators.
    S3, D3, INNER3 = 256, 512, 256
    x3 = jax.random.normal(k_in3, (1, 1, S3, D3), jnp.float32).astype(jnp.bfloat16)
    mod3 = TtGEGLU(dim=D3, inner_dim=INNER3, key=k_p3, weights_dtype=jnp.bfloat16)
    out4 = jax.block_until_ready(
        geglu_matmul(x3.reshape(S3, D3), mod3.w_p, mod3.b_p, mod3.inner_dim,
                     vmem_budget=512 * 1024)
    )
    ref4 = reference(x3, mod3).reshape(S3, INNER3)
    assert jnp.allclose(out4.astype(jnp.float32), ref4, atol=2e-2, rtol=2e-2)

    print("KERNEL_OK")
</pallas_src>

<mosaic_0001>
module attributes {stable_mosaic.version = 11 : i64} {
  func.func @_geglu_kernel_resident(%arg0: i32, %arg1: memref<64x256xbf16, #tpu.memory_space<vmem>>, %arg2: memref<256x512xbf16, #tpu.memory_space<vmem>>, %arg3: memref<1x512xf32, #tpu.memory_space<vmem>>, %arg4: memref<64x256xbf16, #tpu.memory_space<vmem>>) attributes {dimension_semantics = [#tpu.dimension_semantics<parallel>], iteration_bounds = array<i64: 4>, scalar_prefetch = 0 : i64, scratch_operands = 0 : i64, tpu.core_type = #tpu.core_type<tc>, window_params = [{transform_indices = @transform_0, window_bounds = array<i64: 64, 256>}, {pipeline_mode = #tpu.pipeline_mode<synchronous>, transform_indices = @transform_1, window_bounds = array<i64: 256, 512>}, {pipeline_mode = #tpu.pipeline_mode<synchronous>, transform_indices = @transform_2, window_bounds = array<i64: 1, 512>}, {transform_indices = @transform_3, window_bounds = array<i64: 64, 256>}]} {
    %c0 = arith.constant 0 : index
    %c0_0 = arith.constant 0 : index
    %0 = vector.load %arg1[%c0, %c0_0] : memref<64x256xbf16, #tpu.memory_space<vmem>>, vector<64x256xbf16>
    %c0_1 = arith.constant 0 : index
    %c0_2 = arith.constant 0 : index
    %1 = vector.load %arg2[%c0_1, %c0_2] : memref<256x512xbf16, #tpu.memory_space<vmem>>, vector<256x512xbf16>
    %cst = arith.constant dense<0.000000e+00> : vector<64x512xf32>
    %2 = tpu.matmul %0, %1, %cst {dimension_numbers = #tpu.dot_dimension_numbers<[1], [0], [0], [1], [0, 0, 1, 1], [], []>} : vector<64x256xbf16>, vector<256x512xbf16>, vector<64x512xf32> -> vector<64x512xf32>
    %c0_3 = arith.constant 0 : index
    %c0_4 = arith.constant 0 : index
    %3 = vector.load %arg3[%c0_3, %c0_4] : memref<1x512xf32, #tpu.memory_space<vmem>>, vector<1x512xf32>
    %4 = vector.broadcast %3 : vector<1x512xf32> to vector<64x512xf32>
    %5 = arith.addf %2, %4 : vector<64x512xf32>
    %6 = vector.extract_strided_slice %5 {offsets = [0, 0], sizes = [64, 256], strides = [1, 1]} : vector<64x512xf32> to vector<64x256xf32>
    %7 = vector.extract_strided_slice %5 {offsets = [0, 256], sizes = [64, 256], strides = [1, 1]} : vector<64x512xf32> to vector<64x256xf32>
    %cst_5 = arith.constant 5.000000e-01 : f32
    %8 = vector.broadcast %cst_5 : f32 to vector<64x256xf32>
    %9 = arith.mulf %8, %7 : vector<64x256xf32>
    %cst_6 = arith.constant 4.471500e-02 : f32
    %10 = vector.broadcast %cst_6 : f32 to vector<64x256xf32>
    %11 = arith.mulf %10, %7 : vector<64x256xf32>
    %12 = arith.mulf %11, %7 : vector<64x256xf32>
    %13 = arith.mulf %12, %7 : vector<64x256xf32>
    %14 = arith.addf %7, %13 : vector<64x256xf32>
    %cst_7 = arith.constant 0.797884583 : f32
    %15 = vector.broadcast %cst_7 : f32 to vector<64x256xf32>
    %16 = arith.mulf %15, %14 : vector<64x256xf32>
    %17 = math.tanh %16 : vector<64x256xf32>
    %cst_8 = arith.constant 1.000000e+00 : f32
    %18 = vector.broadcast %cst_8 : f32 to vector<64x256xf32>
    %19 = arith.addf %18, %17 : vector<64x256xf32>
    %20 = arith.mulf %9, %19 : vector<64x256xf32>
    %21 = arith.mulf %6, %20 : vector<64x256xf32>
    %22 = arith.truncf %21 : vector<64x256xf32> to vector<64x256xbf16>
    %c0_9 = arith.constant 0 : index
    %c0_10 = arith.constant 0 : index
    %23 = vector.load %arg4[%c0_9, %c0_10] : memref<64x256xbf16, #tpu.memory_space<vmem>>, vector<64x256xbf16>
    tpu.vector_store %arg4[%c0_9, %c0_10], %22 {strides = array<i32>} : memref<64x256xbf16, #tpu.memory_space<vmem>>, vector<64x256xbf16>,
    return
  }
  func.func @transform_0(%arg0: i32) -> (i32, i32) {
    %c0_i32 = arith.constant 0 : i32
    %c0_i32_0 = arith.constant 0 : i32
    return %arg0, %c0_i32 : i32, i32
  }
  func.func @transform_1(%arg0: i32) -> (i32, i32) {
    %c0_i32 = arith.constant 0 : i32
    %c0_i32_0 = arith.constant 0 : i32
    %c0_i32_1 = arith.constant 0 : i32
    return %c0_i32, %c0_i32_0 : i32, i32
  }
  func.func @transform_2(%arg0: i32) -> (i32, i32) {
    %c0_i32 = arith.constant 0 : i32
    %c0_i32_0 = arith.constant 0 : i32
    %c0_i32_1 = arith.constant 0 : i32
    return %c0_i32, %c0_i32_0 : i32, i32
  }
  func.func @transform_3(%arg0: i32) -> (i32, i32) {
    %c0_i32 = arith.constant 0 : i32
    %c0_i32_0 = arith.constant 0 : i32
    return %arg0, %c0_i32 : i32, i32
  }
}

</mosaic_0001>

<bundles_post_ra>
// kernel: tpu_custom_call.1
= control target key start
LH: loop header
LB: loop body
LE: loop exit
PB: predicated region body
PF: predicated region fallthrough
CT: control target
= control target key end

     0   :  { %8 = vsyncpa [#allocation3], 0  ;;  %s2034_s0 = inlined_call_operand.hbm [shape: bf16[256,256], index: 0, kind: input, shape index: {}]   ;;  %s2035_s1 = inlined_call_operand.hbm [shape: bf16[256,512], index: 1, kind: input, shape index: {}]   ;;  %s2036_s2 = inlined_call_operand.hbm [shape: f32[1,512], index: 2, kind: input, shape index: {}]   ;;  %s2037_s3 = inlined_call_operand.hbm [shape: bf16[256,256], index: 3, kind: output, shape index: {}]  }
   0x1   :  { %10 = vsyncpa [#allocation3 + $0x1], 0 }
   0x2   :  { %11 = vsyncpa [#allocation6], 0 }
   0x3   :  { %12 = vsyncpa [#allocation4], 0 }
   0x4   :  { %14 = vsyncpa [#allocation4 + $0x1], 0  ;;  %s1647_s12 = smov 0   ;;  %s1649_s13 = smov 0  }
   0x5   :  { %s1651_s14 = smov 0   ;;  %s1653_s15 = smov 0  }
   0x6 LB: > { %s1668_s16 = sadd.s32 4294967295, %s1615_s15   ;;  %s1142_s17 = sadd.s32 4294967294, %s1615_s15   ;;  %s1615_s15 = sphi %s1653_s15, %s2058_s15   ;;  %s1611_s14 = sphi %s1651_s14, %s2057_s14   ;;  %s1607_s13 = sphi %s1649_s13, %s2056_s13   ;;  %s1603_s12 = sphi %s1647_s12, %s2055_s12  }
   0x7   : > { %p40_p0 = scmp.ne.s32.totalorder %s1607_s13, %s1603_s12  ;;  %p2038_p1 = scmp.eq.s32.totalorder %s1668_s16, 0 }
   0x8   : > { %p112_p3 = scmp.eq.s32.totalorder %s1142_s17, 3  ;;  %p1143_p5 = scmp.ge.s32.totalorder %s1615_s15, 1 }
   0x9   : > { %p1677_p4 = por %p2038_p1, %p40_p0  ;;  %p119_p7 = scmp.lt.s32.totalorder %s1615_s15, 5 }
   0xa   : > { %p1682_p6 = por %p112_p3, %p40_p0  ;;  %s1617_s21 = smov [#allocation5]  }
   0xb   : > { %s2042_s18 = scalar_select %p1677_p4, 1, 0 }
   0xc   : > { %s2043_s19 = scalar_select %p1682_p6, 1, 0 }
   0xd   : > { %p1687_p8 = pnand %p1143_p5, %p119_p7  ;;  %s131_s22 = sshll.u32 %s1617_s21, 4  ;;  %s132_s22 = int_to_ptr.vmem [resolvable:$true] %s131_s22 }
   0xe   : > { %s1618_s24 = smov [#allocation7]   ;;  %s1478_s26 = scalar_lea.vmem %s132_s22, 8192 }
   0xf   : > { %s2044_s20 = scalar_select %p1687_p8, 1, 0 }
  0x10   : > { %p1266_p9 = pneg %p1687_p8  ;;  %s145_s25 = sshll.u32 %s1618_s24, 4  ;;  %s146_s25 = int_to_ptr.vmem [resolvable:$true] %s145_s25 }
  0x11   : > { %p1479_p12 = scmp.ne.s32.totalorder %s132_s22, %s1478_s26  ;;  %p1486_p3 = scmp.lt.s32.totalorder %s132_s22, %s132_s22 }
  0x12   : > { %p1695_p10 = pnand %p1266_p9, %p2038_p1  ;;  %p1487_p5 = scmp.lt.s32.totalorder %s1478_s26, %s1478_s26 }
  0x14   : > { %p1469_p11 = pneg %p1695_p10  ;;  %p1488_p7 = por %p1487_p5, %p1486_p3 }
  0x16   : > { %p1481_p13 = pnand %p1479_p12, %p1469_p11 }
  0x18   : > { %p1482_p0 = pneg %p1481_p13 }
  0x1a   : > { %p1489_p9 = pnand %p1488_p7, %p1482_p0 }
  0x1c   : > { %1492 = shalt.err (!%p1489_p9)
}
  0x1d   : > { %s1619_s27 = smov 256   ;;  %s1620_s28 = smov 16  }
  0x1e   : > { %1269 = dma.hbm_to_vmem [thread:$0]  (!%p1695_p10), %s2035_s1, 8192, %s132_s22, [#allocation6], %s1619_s27, %s1619_s27, %s1620_s28  }
  0x1f   : > { %s1504_s4 = scalar_lea.vmem %s146_s25, 64  ;;  %p1512_p2 = scmp.lt.s32.totalorder %s146_s25, %s146_s25 }
  0x20   : > { %p1505_p1 = scmp.ne.s32.totalorder %s146_s25, %s1504_s4  ;;  %p1513_p6 = scmp.lt.s32.totalorder %s1504_s4, %s1504_s4 }
  0x22   : > { %p1507_p12 = pnand %p1505_p1, %p1469_p11  ;;  %p1514_p3 = por %p1513_p6, %p1512_p2 }
  0x24   : > { %p1508_p13 = pneg %p1507_p12 }
  0x26   : > { %p1515_p0 = pnand %p1514_p3, %p1508_p13 }
  0x28   : > { %1518 = shalt.err (!%p1515_p0)
}
  0x29   : > { %1272 = dma.hbm_to_vmem [thread:$0]  (!%p1695_p10), %s2036_s2, 64, %s146_s25, [#allocation6]  }
  0x2a   : > { %s1718_s7 = sadd.s32 1, %s1615_s15   ;;  %s27_s8 = sadd.s32 1, %s1611_s14 }
  0x2b   : > { %s24_s9 = ssub.s32 %s1615_s15, %s1718_s7  ;;  %p34_p1 = scmp.ne.s32.totalorder %s1611_s14, %s1607_s13 }
  0x2c   : > { %p25_p2 = scmp.eq.s32.totalorder %s24_s9, 0  ;;  %p35_p6 = scmp.eq.s32.totalorder %s1615_s15, 0 }
  0x2d   : > { %p2046_p11 = scmp.eq.s32.totalorder %s1668_s16, 3  ;;  %p1283_p7 = scmp.lt.s32.totalorder %s1615_s15, 4 }
  0x2e   : > { %s1734_s11 = scalar_select %p25_p2, %s1611_s14, %s27_s8  }
  0x2f   : > { %p1728_p5 = por %p2046_p11, %p34_p1  ;;  %p36_p9 = por %p35_p6, %p34_p1 }
  0x30   : > { %s156_s17 = sand.u32 1, %s1611_s14   ;;  %s1243_s22 = sshll.u32 %s1615_s15, 10 }
  0x31   : > { %s2047_s10 = scalar_select %p1728_p5, 1, 0 }
  0x32   : > { %s1147_s21 = sshll.u32 %s156_s17, 6  ;;  %s1741_s25 = scalar_lea.hbm %s2034_s0, %s1243_s22 }
  0x33   : > { %s160_s26 = scalar_lea.vmem [#allocation2], %s1147_s21  ;;  %p1745_p10 = pnand %p1283_p7, %p36_p9 }
  0x34   : > { %s168_s27 = sshll.u32 %s160_s26, 4  ;;  %s1749_s29 = scalar_lea.sflag [#allocation3], %s156_s17  ;;  %s1743_s27 = int_to_ptr.vmem [resolvable:$true] %s168_s27 }
  0x35   : > { %s1519_s30 = scalar_lea.hbm %s1741_s25, 1024  ;;  %p1521_p13 = pneg %p1745_p10 }
  0x36   : > { %p1520_p12 = scmp.ne.s32.totalorder %s1741_s25, %s1519_s30  ;;  %s1524_s6 = scalar_lea.hbm %s2034_s0, 4096 }
  0x37   : > { %p1525_p1 = scmp.lt.s32.totalorder %s1741_s25, %s2034_s0  ;;  %p1526_p2 = scmp.lt.s32.totalorder %s1524_s6, %s1519_s30 }
  0x38   : > { %p1522_p3 = pnand %p1521_p13, %p1520_p12 }
  0x39   : > { %p1527_p6 = por %p1526_p2, %p1525_p1 }
  0x3a   : > { %p1523_p0 = pneg %p1522_p3 }
  0x3c   : > { %p1528_p11 = pnand %p1527_p6, %p1523_p0 }
  0x3e   : > { %1531 = shalt.err (!%p1528_p11)
}
  0x3f   : > { %s1532_s17 = scalar_lea.vmem %s1743_s27, 1024  ;;  %s1621_s21 = smov [#allocation2]  }
  0x40   : > { %p1533_p7 = scmp.ne.s32.totalorder %s1743_s27, %s1532_s17  ;;  %s1537_s22 = sshll.u32 %s1621_s21, 4  ;;  %s1538_s22 = int_to_ptr.vmem [resolvable:$false] %s1537_s22 }
  0x41   : > { %s1539_s23 = scalar_lea.vmem %s1538_s22, 2048  ;;  %p1540_p3 = scmp.lt.s32.totalorder %s1743_s27, %s1538_s22 }
  0x42   : > { %p1535_p9 = pnand %p1533_p7, %p1521_p13  ;;  %p1541_p5 = scmp.lt.s32.totalorder %s1539_s23, %s1532_s17 }
  0x44   : > { %p1536_p12 = pneg %p1535_p9  ;;  %p1542_p4 = por %p1541_p5, %p1540_p3 }
  0x46   : > { %p1543_p8 = pnand %p1542_p4, %p1536_p12 }
  0x48   : > { %1546 = shalt.err (!%p1543_p8)
}
  0x49   : > { %s1622_s24 = smov 128   ;;  %s1623_s26 = smov 8  }
  0x4a   : > { %1276 = dma.hbm_to_vmem [thread:$0]  (!%p1745_p10), %s1741_s25, 1024, %s1743_s27, %s1749_s29, %s1622_s24, %s1622_s24, %s1623_s26  }
  0x4b   : > { %p2049_p13 = scmp.ne.s32.totalorder %s2044_s20, 0 }
  0x4c   : > { %s1773_s30 = sand.u32 (!%p2049_p13), 1, %s1607_s13   ;;  %p2050_p4 = scmp.ne.s32.totalorder (!%p2049_p13), %s2042_s18, 0 }
  0x4d   : > { %180 = sbr.rel (%p2049_p13) target bundleno = 427 (0x1ab), region = 32  ;;  %s1152_s4 = sshll.u32 (!%p2049_p13), %s1773_s30, 6 }
  0x4e   : > { %s183_s5 = scalar_lea.sflag (!%p2049_p13), [#allocation3], %s1773_s30  ;;  %s1779_s6 = scalar_lea.vmem (!%p2049_p13), [#allocation2], %s1152_s4 }
  0x52   : > { %1590 = dma.done.wait (%p2050_p4), %s183_s5, 1024  }
  0x53   : > { %1592 = vsyncadd (%p2050_p4), %s183_s5, 4294966272  ;;  %p2051_p8 = scmp.eq.s32.totalorder %s1668_s16, 0 }
  0x55   : > { %1594 = dma.done.wait (%p2051_p8), [#allocation6], 8256   ;;  %p2052_p5 = pmov %p2051_p8 }
  0x56   : > { %v1327_v0 = vld [vmem:[#allocation5 + $0xec] ss:$16 sps:$4 sm:$0xff]   ;;  %v1329_v1 = vld [vmem:[#allocation5 + $0xe8] ss:$16 sps:$4 sm:$0xff]   ;;  %v1345_v7 = vld [vmem:[#allocation5 + $0xe4] ss:$16 sps:$4 sm:$0xff]  }
  0x57   : > { %1596 = vsyncadd (%p2052_p5), [#allocation6], 4294959040  ;;  %746 = vmatprep.subr.bf16.mxu1 %v1327_v0  ;;  %v1330_v2 = vld [vmem:[#allocation5 + $0xcc] ss:$16 sps:$4 sm:$0xff]   ;;  %v1332_v3 = vld [vmem:[#allocation5 + $0xc8] ss:$16 sps:$4 sm:$0xff]   ;;  %673 = vmatprep.subr.bf16.mxu0 %v1345_v7 }
  0x58   : > { %747 = vmatpush1.bf16.msra.mxu1 %v1329_v1  ;;  %v1333_v4 = vld [vmem:[#allocation5 + $0xac] ss:$16 sps:$4 sm:$0xff]   ;;  %v1335_v5 = vld [vmem:[#allocation5 + $0xa8] ss:$16 sps:$4 sm:$0xff]   ;;  %v1347_v8 = vld [vmem:[#allocation5 + $0xe0] ss:$16 sps:$4 sm:$0xff]  }
  0x59   : > { %748 = vmatprep.subr.bf16.mxu1 %v1330_v2  ;;  %v1336_v6 = vld [vmem:[#allocation5 + $0x8c] ss:$16 sps:$4 sm:$0xff]   ;;  %v1338_v9 = vld [vmem:[#allocation5 + $0x88] ss:$16 sps:$4 sm:$0xff]   ;;  %674 = vmatpush1.bf16.msra.mxu0 %v1347_v8  ;;  %v1351_v10 = vld [vmem:[#allocation5 + $0xc4] ss:$16 sps:$4 sm:$0xff]   ;;  %v293_v8 = vlaneseq }
  0x5a   : > { %v1353_v11 = vld [vmem:[#allocation5 + $0xc0] ss:$16 sps:$4 sm:$0xff]   ;;  %v1339_v12 = vld [vmem:[#allocation5 + $0x6c] ss:$16 sps:$4 sm:$0xff]   ;;  %675 = vmatprep.subr.bf16.mxu0 %v1351_v10  ;;  %v1341_v13 = vld [vmem:[#allocation5 + $0x68] ss:$16 sps:$4 sm:$0xff]  }
  0x5b   : > { %v1357_v14 = vld [vmem:[#allocation5 + $0xa4] ss:$16 sps:$4 sm:$0xff]   ;;  %v1342_v15 = vld [vmem:[#allocation5 + $0x4c] ss:$16 sps:$4 sm:$0xff]   ;;  %v1359_v16 = vld [vmem:[#allocation5 + $0xa0] ss:$16 sps:$4 sm:$0xff]  }
  0x5c   : > { %749 = vmatpush1.bf16.msra.mxu1 %v1332_v3  ;;  %v1363_v17 = vld [vmem:[#allocation5 + $0x84] ss:$16 sps:$4 sm:$0xff]   ;;  %v1344_v18 = vld [vmem:[#allocation5 + $0x48] ss:$16 sps:$4 sm:$0xff]   ;;  %v1348_v19 = vld [vmem:[#allocation5 + $0x2c] ss:$16 sps:$4 sm:$0xff]  }
  0x5d   : > { %750 = vmatprep.subr.bf16.mxu1 %v1333_v4  ;;  %676 = vmatpush1.bf16.msra.mxu0 %v1353_v11  ;;  %v1365_v20 = vld [vmem:[#allocation5 + $0x80] ss:$16 sps:$4 sm:$0xff]   ;;  %v1369_v21 = vld [vmem:[#allocation5 + $0x64] ss:$16 sps:$4 sm:$0xff]   ;;  %v1350_v22 = vld [vmem:[#allocation5 + $0x28] ss:$16 sps:$4 sm:$0xff]  }
  0x5e   : > { %677 = vmatprep.subr.bf16.mxu0 %v1357_v14  ;;  %v1354_v23 = vld [vmem:[#allocation5 + $0xc] ss:$16 sps:$4 sm:$0xff]   ;;  %v1371_v24 = vld [vmem:[#allocation5 + $0x60] ss:$16 sps:$4 sm:$0xff]   ;;  %v1375_v25 = vld [vmem:[#allocation5 + $0x44] ss:$16 sps:$4 sm:$0xff]  }
  0x5f   : > { %v1356_v26 = vld [vmem:[#allocation5 + $0x8] ss:$16 sps:$4 sm:$0xff]   ;;  %v1360_v27 = vld [vmem:[#allocation5 + $0x1ec] ss:$16 sps:$4 sm:$0xff]   ;;  %v1377_v28 = vld [vmem:[#allocation5 + $0x40] ss:$16 sps:$4 sm:$0xff]  }
  0x60   : > { %751 = vmatpush1.bf16.msra.mxu1 %v1335_v5  ;;  %v1381_v29 = vld [vmem:[#allocation5 + $0x24] ss:$16 sps:$4 sm:$0xff]   ;;  %v1362_v30 = vld [vmem:[#allocation5 + $0x1e8] ss:$16 sps:$4 sm:$0xff]   ;;  %v1366_v31 = vld [vmem:[#allocation5 + $0x1cc] ss:$16 sps:$4 sm:$0xff]  }
  0x61   : > { %752 = vmatprep.subr.bf16.mxu1 %v1336_v6  ;;  %678 = vmatpush1.bf16.msra.mxu0 %v1359_v16  ;;  %v1383_v32 = vld [vmem:[#allocation5 + $0x20] ss:$16 sps:$4 sm:$0xff]   ;;  %v1387_v33 = vld [vmem:[#allocation5 + $0x4] ss:$16 sps:$4 sm:$0xff]   ;;  %v1368_v34 = vld [vmem:[#allocation5 + $0x1c8] ss:$16 sps:$4 sm:$0xff]  }
  0x62   : > { %679 = vmatprep.subr.bf16.mxu0 %v1363_v17  ;;  %v1372_v35 = vld [vmem:[#allocation5 + $0x1ac] ss:$16 sps:$4 sm:$0xff]   ;;  %v1389_v36 = vld [vmem:[#allocation5] ss:$16 sps:$4 sm:$0xff]   ;;  %v1393_v37 = vld [vmem:[#allocation5 + $0x1e4] ss:$16 sps:$4 sm:$0xff]  }
  0x63   : > { %v1410_v38 = vld [vmem:[%s1779_s6 + $0x4] ss:$8 sps:$4 sm:$0xff]   ;;  %v1374_v39 = vld [vmem:[#allocation5 + $0x1a8] ss:$16 sps:$4 sm:$0xff]   ;;  %v1395_v41 = vld [vmem:[#allocation5 + $0x1e0] ss:$16 sps:$4 sm:$0xff]  }
  0x64   : > { %753 = vmatpush1.bf16.msra.mxu1 %v1338_v9  ;;  %v1378_v40 = vld [vmem:[#allocation5 + $0x18c] ss:$16 sps:$4 sm:$0xff]   ;;  %v1399_v42 = vld [vmem:[#allocation5 + $0x1c4] ss:$16 sps:$4 sm:$0xff]   ;;  %778 = vmatprep.mubr.bf16.mxu1 %v1410_v38  ;;  %v1380_v43 = vld [vmem:[#allocation5 + $0x188] ss:$16 sps:$4 sm:$0xff]  }
  0x65   : > { %754 = vmatprep.subr.bf16.mxu1 %v1339_v12  ;;  %680 = vmatpush1.bf16.msra.mxu0 %v1365_v20  ;;  %v1384_v44 = vld [vmem:[#allocation5 + $0x16c] ss:$16 sps:$4 sm:$0xff]   ;;  %v1401_v45 = vld [vmem:[#allocation5 + $0x1c0] ss:$16 sps:$4 sm:$0xff]   ;;  %v1405_v46 = vld [vmem:[#allocation5 + $0x1a4] ss:$16 sps:$4 sm:$0xff]  }
  0x66   : > { %681 = vmatprep.subr.bf16.mxu0 %v1369_v21  ;;  %705 = vmatprep.mubr.bf16.mxu0 %v1410_v38  ;;  %v1386_v47 = vld [vmem:[#allocation5 + $0x168] ss:$16 sps:$4 sm:$0xff]   ;;  %v1407_v48 = vld [vmem:[#allocation5 + $0x1a0] ss:$16 sps:$4 sm:$0xff]   ;;  %v1390_v49 = vld [vmem:[#allocation5 + $0x14c] ss:$16 sps:$4 sm:$0xff]  }
  0x67   : > { %v1411_v50 = vld [vmem:[#allocation5 + $0x184] ss:$16 sps:$4 sm:$0xff]   ;;  %v1392_v51 = vld [vmem:[#allocation5 + $0x148] ss:$16 sps:$4 sm:$0xff]   ;;  %v1413_v52 = vld [vmem:[#allocation5 + $0x180] ss:$16 sps:$4 sm:$0xff]  }
  0x68   : > { %755 = vmatpush1.bf16.msra.mxu1 %v1341_v13  ;;  %v1396_v53 = vld [vmem:[#allocation5 + $0x12c] ss:$16 sps:$4 sm:$0xff]   ;;  %v1414_v54 = vld [vmem:[#allocation5 + $0x164] ss:$16 sps:$4 sm:$0xff]   ;;  %v1398_v55 = vld [vmem:[#allocation5 + $0x128] ss:$16 sps:$4 sm:$0xff]  }
  0x69   : > { %756 = vmatprep.subr.bf16.mxu1 %v1342_v15  ;;  %682 = vmatpush1.bf16.msra.mxu0 %v1371_v24  ;;  %v1416_v56 = vld [vmem:[#allocation5 + $0x160] ss:$16 sps:$4 sm:$0xff]   ;;  %v1402_v57 = vld [vmem:[#allocation5 + $0x10c] ss:$16 sps:$4 sm:$0xff]   ;;  %v1420_v58 = vld [vmem:[#allocation5 + $0x144] ss:$16 sps:$4 sm:$0xff]  }
  0x6a   : > { %683 = vmatprep.subr.bf16.mxu0 %v1375_v25  ;;  %v1404_v59 = vld [vmem:[#allocation5 + $0x108] ss:$16 sps:$4 sm:$0xff]   ;;  %v1422_v60 = vld [vmem:[#allocation5 + $0x140] ss:$16 sps:$4 sm:$0xff]   ;;  %v1423_v61 = vld [vmem:[#allocation5 + $0x124] ss:$16 sps:$4 sm:$0xff]  }
  0x6b   : > { %v1408_v62 = vld [vmem:[%s1779_s6] ss:$8 sps:$4 sm:$0xff]   ;;  %v1417_v63 = vld [vmem:[%s1779_s6 + $0x14] ss:$8 sps:$4 sm:$0xff]   ;;  %v1419_v3 = vld [vmem:[%s1779_s6 + $0x10] ss:$8 sps:$4 sm:$0xff]  }
  0x6c   : > { %757 = vmatpush1.bf16.msra.mxu1 %v1344_v18  ;;  %v1425_v0 = vld [vmem:[#allocation5 + $0x120] ss:$16 sps:$4 sm:$0xff]   ;;  %v1429_v1 = vld [vmem:[#allocation5 + $0x104] ss:$16 sps:$4 sm:$0xff]   ;;  %v1797_v9 = vshrl.u32 %v293_v8, 7  ;;  %s1940_s18 = scalar_lea.vmem [#allocation8], %s1152_s4 }
  0x6d   : > { %758 = vmatprep.subr.bf16.mxu1 %v1348_v19  ;;  %684 = vmatpush1.bf16.msra.mxu0 %v1377_v28  ;;  %v1431_v2 = vld [vmem:[#allocation5 + $0x100] ss:$16 sps:$4 sm:$0xff]   ;;  %v1426_v4 = vld [vmem:[%s1779_s6 + $0x24] ss:$8 sps:$4 sm:$0xff]   ;;  %v1432_v6 = vld [vmem:[%s1779_s6 + $0x34] ss:$8 sps:$4 sm:$0xff]  }
  0x6e   : > { %685 = vmatprep.subr.bf16.mxu0 %v1381_v29  ;;  %v1428_v5 = vld [vmem:[%s1779_s6 + $0x20] ss:$8 sps:$4 sm:$0xff]   ;;  %v1434_v7 = vld [vmem:[%s1779_s6 + $0x30] ss:$8 sps:$4 sm:$0xff]   ;;  %v303_v10 = vsub.s32 2, %v1797_v9  ;;  %v307_v12 = vsub.s32 3, %v1797_v9 }
  0x6f   : > { %v1800_v11 = vld [vmem:[#allocation7] sm:$0xf]  ;;  %s1253_s20 = sshll.u32 %s1668_s16, 10  ;;  %s1050_s25 = sshll.u32 %s1940_s18, 4  ;;  %s1991_s25 = int_to_ptr.vmem [resolvable:$true] %s1050_s25 }
  0x70   : > { %759 = vmatpush1.bf16.msra.mxu1 %v1350_v22  ;;  %v1804_v13 = vrot.slane %v1800_v11, %v303_v10  ;;  %v1807_v14 = vrot.slane %v1800_v11, %v307_v12  ;;  %s1989_s29 = scalar_lea.hbm %s2037_s3, %s1253_s20  ;;  %s1036_s8 = scalar_lea.sflag [#allocation4], %s1773_s30 }
  0x71   : > { %760 = vmatprep.subr.bf16.mxu1 %v1354_v23  ;;  %686 = vmatpush1.bf16.msra.mxu0 %v1383_v32  ;;  %s1547_s9 = scalar_lea.vmem %s1991_s25, 1024  ;;  %p2053_p0 = scmp.ne.s32.totalorder %s2047_s10, 0 }
  0x72   : > { %687 = vmatprep.subr.bf16.mxu0 %v1387_v33  ;;  %p1548_p10 = scmp.ne.s32.totalorder %s1991_s25, %s1547_s9  ;;  %s1624_s16 = smov [#allocation8]  }
  0x73   : > { %s1551_s17 = sshll.u32 %s1624_s16, 4  ;;  %s1552_s17 = int_to_ptr.vmem [resolvable:$false] %s1551_s17 }
  0x74   : > { %761 = vmatpush1.bf16.msra.mxu1 %v1356_v26  ;;  %p1549_p1 = pnand %p1548_p10, %p2053_p0  ;;  %s1553_s21 = scalar_lea.vmem %s1552_s17, 2048 }
  0x75   : > { %762 = vmatprep.subr.bf16.mxu1 %v1360_v27  ;;  %688 = vmatpush1.bf16.msra.mxu0 %v1389_v36  ;;  %p1554_p6 = scmp.lt.s32.totalorder %s1991_s25, %s1552_s17  ;;  %p1555_p11 = scmp.lt.s32.totalorder %s1553_s21, %s1547_s9 }
  0x76   : > { %689 = vmatprep.subr.bf16.mxu0 %v1393_v37  ;;  %p1550_p2 = pneg %p1549_p1 }
  0x77   : > { %p1556_p7 = por %p1555_p11, %p1554_p6 }
  0x78   : > { %763 = vmatpush2.bf16.msra.mxu1 %v1362_v30 }
  0x79   : > { %764 = vmatprep.subr.bf16.mxu1 %v1366_v31  ;;  %690 = vmatpush2.bf16.msra.mxu0 %v1395_v41  ;;  %p1557_p9 = pnand %p1556_p7, %p1550_p2 }
  0x7a   : > { %691 = vmatprep.subr.bf16.mxu0 %v1399_v42 }
  0x7c   : > { %765 = vmatpush2.bf16.msra.mxu1 %v1368_v34 }
  0x7d   : > { %766 = vmatprep.subr.bf16.mxu1 %v1372_v35  ;;  %692 = vmatpush2.bf16.msra.mxu0 %v1401_v45 }
  0x7e   : > { %693 = vmatprep.subr.bf16.mxu0 %v1405_v46 }
  0x80   : > { %767 = vmatpush2.bf16.msra.mxu1 %v1374_v39 }
  0x81   : > { %768 = vmatprep.subr.bf16.mxu1 %v1378_v40  ;;  %694 = vmatpush2.bf16.msra.mxu0 %v1407_v48 }
  0x82   : > { %695 = vmatprep.subr.bf16.mxu0 %v1411_v50 }
  0x84   : > { %769 = vmatpush2.bf16.msra.mxu1 %v1380_v43 }
  0x85   : > { %770 = vmatprep.subr.bf16.mxu1 %v1384_v44  ;;  %696 = vmatpush2.bf16.msra.mxu0 %v1413_v52 }
  0x86   : > { %697 = vmatprep.subr.bf16.mxu0 %v1414_v54 }
  0x88   : > { %771 = vmatpush2.bf16.msra.mxu1 %v1386_v47 }
  0x89   : > { %772 = vmatprep.subr.bf16.mxu1 %v1390_v49  ;;  %698 = vmatpush2.bf16.msra.mxu0 %v1416_v56 }
  0x8a   : > { %699 = vmatprep.subr.bf16.mxu0 %v1420_v58 }
  0x8c   : > { %773 = vmatpush2.bf16.msra.mxu1 %v1392_v51 }
  0x8d   : > { %774 = vmatprep.subr.bf16.mxu1 %v1396_v53  ;;  %700 = vmatpush2.bf16.msra.mxu0 %v1422_v60 }
  0x8e   : > { %701 = vmatprep.subr.bf16.mxu0 %v1423_v61 }
  0x90   : > { %775 = vmatpush2.bf16.msra.mxu1 %v1398_v55 }
  0x91   : > { %776 = vmatprep.subr.bf16.mxu1 %v1402_v57  ;;  %702 = vmatpush2.bf16.msra.mxu0 %v1425_v0 }
  0x92   : > { %703 = vmatprep.subr.bf16.mxu0 %v1429_v1 }
  0x94   : > { %777 = vmatpush2.bf16.msra.mxu1 %v1404_v59 }
  0x95   : > { %704 = vmatpush2.bf16.msra.mxu0 %v1431_v2 }
  0x97   : > { %779 = vmatmul.mubr.bf16.vlgmr.msra.gmra.mxu1 %v1408_v62 }
  0x98   : > { %788 = vmatprep.mubr.bf16.mxu1 %v1417_v63  ;;  %706 = vmatmul.mubr.bf16.vlgmr.msra.gmra.mxu0 %v1408_v62  ;;  %v295_v62 = vsub.s32 0, %v1797_v9 }
  0x99   : > { %715 = vmatprep.mubr.bf16.mxu0 %v1417_v63  ;;  %v299_v63 = vsub.s32 1, %v1797_v9 }
  0x9a   : > { %v1874_v12 = vrot.slane %v1800_v11, %v295_v62 }
  0x9f   : > { %789 = vmatmul.mubr.bf16.gmra.mxu1 %v1419_v3 }
  0xa0   : > { %798 = vmatprep.mubr.bf16.mxu1 %v1426_v4  ;;  %716 = vmatmul.mubr.bf16.gmra.mxu0 %v1419_v3 }
  0xa1   : > { %725 = vmatprep.mubr.bf16.mxu0 %v1426_v4 }
  0xa7   : > { %799 = vmatmul.mubr.bf16.gmra.mxu1 %v1428_v5 }
  0xa8   : > { %808 = vmatprep.mubr.bf16.mxu1 %v1432_v6  ;;  %726 = vmatmul.mubr.bf16.gmra.mxu0 %v1428_v5 }
  0xa9   : > { %735 = vmatprep.mubr.bf16.mxu0 %v1432_v6 }
  0xaf   : > { %809 = vmatmul.mubr.bf16.gmra.mxu1 %v1434_v7 }
  0xb0   : > { %736 = vmatmul.mubr.bf16.gmra.mxu0 %v1434_v7 }
 0x157   : > { %v780_v15 = vpop.f32.mrf.mxu1 }
 0x158   : > { %v1810_v16 = vadd.f32 %v780_v15, %v1804_v13  ;;  %v1827_v30 = vpop.f32.mrf.mxu0  ;;  %v1877_v15 = vrot.slane %v1800_v11, %v299_v63 }
 0x159   : > { %v782_v17 = vpop.f32.mrf.mxu1 }
 0x15a   : > { %v835_v18 = vmul.f32 0.044715, %v1810_v16  ;;  %v1814_v19 = vadd.f32 %v782_v17, %v1807_v14  ;;  %v709_v36 = vpop.f32.mrf.mxu0 }
 0x15b   : > { %v784_v20 = vpop.f32.mrf.mxu1 }
 0x15c   : > { %v851_v21 = vmul.f32 %v835_v18, %v1810_v16  ;;  %v836_v22 = vmul.f32 0.044715, %v1814_v19  ;;  %v1819_v23 = vadd.f32 %v784_v20, %v1804_v13  ;;  %v1848_v50 = vpop.f32.mrf.mxu0 }
 0x15d   : > { %v786_v24 = vpop.f32.mrf.mxu1 }
 0x15e   : > { %v852_v25 = vmul.f32 %v836_v22, %v1814_v19  ;;  %v837_v26 = vmul.f32 0.044715, %v1819_v23  ;;  %v1824_v27 = vadd.f32 %v786_v24, %v1807_v14  ;;  %v867_v28 = vmul.f32 %v851_v21, %v1810_v16  ;;  %v713_v2 = vpop.f32.mrf.mxu0 }
 0x15f   : > { %v790_v29 = vpop.f32.mrf.mxu1 }
 0x160   : > { %v853_v31 = vmul.f32 %v837_v26, %v1819_v23  ;;  %v838_v32 = vmul.f32 0.044715, %v1824_v27  ;;  %v1832_v33 = vadd.f32 %v790_v29, %v1804_v13  ;;  %v883_v35 = vadd.f32 %v867_v28, %v1810_v16  ;;  %v717_v20 = vpop.f32.mrf.mxu0 }
 0x161   : > { %v792_v34 = vpop.f32.mrf.mxu1  ;;  %v868_v37 = vmul.f32 %v852_v25, %v1814_v19  ;;  %v819_v26 = vmul.f32 0.5, %v1810_v16  ;;  %v820_v28 = vmul.f32 0.5, %v1814_v19  ;;  %v821_v29 = vmul.f32 0.5, %v1819_v23 }
 0x162   : > { %v854_v38 = vmul.f32 %v838_v32, %v1824_v27  ;;  %v839_v39 = vmul.f32 0.044715, %v1832_v33  ;;  %v1839_v40 = vadd.f32 %v792_v34, %v1807_v14  ;;  %v899_v42 = vmul.f32 0.7978846, %v883_v35 }
 0x163   : > { %v794_v41 = vpop.f32.mrf.mxu1  ;;  %v884_v43 = vadd.f32 %v868_v37, %v1814_v19  ;;  %v869_v44 = vmul.f32 %v853_v31, %v1819_v23  ;;  %v708_v35 = vadd.f32 %v1827_v30, %v1874_v12  ;;  %v822_v16 = vmul.f32 0.5, %v1824_v27  ;;  %v1898_v19 = vpop.f32.mrf.mxu0 }
 0x164   : > { %v855_v45 = vmul.f32 %v839_v39, %v1832_v33  ;;  %v840_v46 = vmul.f32 0.044715, %v1839_v40  ;;  %v1846_v47 = vadd.f32 %v794_v41, %v1804_v13  ;;  %1435 = vtanh.f32 %v899_v42 }
 0x165   : > { %v796_v48 = vpop.f32.mrf.mxu1  ;;  %v900_v49 = vmul.f32 0.7978846, %v884_v43  ;;  %v885_v51 = vadd.f32 %v869_v44, %v1819_v23  ;;  %v870_v52 = vmul.f32 %v854_v38, %v1824_v27  ;;  %v710_v38 = vadd.f32 %v709_v36, %v1877_v15 }
 0x166   : > { %v856_v53 = vmul.f32 %v840_v46, %v1839_v40  ;;  %v841_v54 = vmul.f32 0.044715, %v1846_v47  ;;  %v1855_v55 = vadd.f32 %v796_v48, %v1807_v14  ;;  %v871_v59 = vmul.f32 %v855_v45, %v1832_v33 }
 0x167   : > { %v800_v56 = vpop.f32.mrf.mxu1  ;;  %1437 = vtanh.f32 %v900_v49  ;;  %v901_v57 = vmul.f32 0.7978846, %v885_v51  ;;  %v886_v58 = vadd.f32 %v870_v52, %v1824_v27  ;;  %v823_v36 = vmul.f32 0.5, %v1832_v33 }
 0x168   : > { %v842_v60 = vmul.f32 0.044715, %v1855_v55  ;;  %v1861_v61 = vadd.f32 %v800_v56, %v1804_v13  ;;  %v857_v0 = vmul.f32 %v841_v54, %v1846_v47  ;;  %v887_v4 = vadd.f32 %v871_v59, %v1832_v33  ;;  %v1916_v59 = vpop.f32.mrf.mxu0 }
 0x169   : > { %v802_v1 = vpop.f32.mrf.mxu1  ;;  %1439 = vtanh.f32 %v901_v57  ;;  %v902_v3 = vmul.f32 0.7978846, %v886_v58  ;;  %v872_v9 = vmul.f32 %v856_v53, %v1839_v40  ;;  %v712_v53 = vadd.f32 %v1848_v50, %v1874_v12 }
 0x16a   : > { %v843_v5 = vmul.f32 0.044715, %v1861_v61  ;;  %v1869_v6 = vadd.f32 %v802_v1, %v1807_v14  ;;  %v858_v7 = vmul.f32 %v842_v60, %v1855_v55  ;;  %v903_v10 = vmul.f32 0.7978846, %v887_v4 }
 0x16b   : > { %v804_v8 = vpop.f32.mrf.mxu1  ;;  %1441 = vtanh.f32 %v902_v3  ;;  %v888_v21 = vadd.f32 %v872_v9, %v1839_v40  ;;  %v873_v22 = vmul.f32 %v857_v0, %v1846_v47  ;;  %v714_v56 = vadd.f32 %v713_v2, %v1877_v15 }
 0x16c   : > { %v859_v17 = vmul.f32 %v843_v5, %v1861_v61  ;;  %1443 = vtanh.f32 %v903_v10  ;;  %v844_v24 = vmul.f32 0.044715, %v1869_v6  ;;  %v1884_v25 = vadd.f32 %v804_v8, %v1804_v13 }
 0x16d   : > { %v806_v18 = vpop.f32.mrf.mxu1  ;;  %v904_v31 = vmul.f32 0.7978846, %v888_v21  ;;  %v889_v32 = vadd.f32 %v873_v22, %v1846_v47  ;;  %v874_v34 = vmul.f32 %v858_v7, %v1855_v55  ;;  %v718_v2 = vadd.f32 %v717_v20, %v1874_v12  ;;  %v723_v22 = vpop.f32.mrf.mxu0 }
 0x16e   : > { %v1894_v37 = vadd.f32 %v806_v18, %v1807_v14  ;;  %v875_v42 = vmul.f32 %v859_v17, %v1861_v61  ;;  %v860_v44 = vmul.f32 %v844_v24, %v1869_v6  ;;  %v845_v30 = vmul.f32 0.044715, %v1884_v25 }
 0x16f   : > { %v810_v11 = vpop.f32.mrf.mxu1  ;;  %1445 = vtanh.f32 %v904_v31  ;;  %v905_v23 = vmul.f32 0.7978846, %v889_v32  ;;  %v890_v41 = vadd.f32 %v874_v34, %v1855_v55  ;;  %v824_v34 = vmul.f32 0.5, %v1839_v40  ;;  %v727_v40 = vpop.f32.mrf.mxu0 }
 0x170   : > { %v1905_v45 = vadd.f32 %v810_v11, %v1804_v13  ;;  %v891_v49 = vadd.f32 %v875_v42, %v1861_v61  ;;  %v846_v52 = vmul.f32 0.044715, %v1894_v37  ;;  %v861_v63 = vmul.f32 %v845_v30, %v1884_v25 }
 0x171   : > { %v812_v39 = vpop.f32.mrf.mxu1  ;;  %v1436_v43 = vpop.eup %1435  ;;  %1447 = vtanh.f32 %v905_v23  ;;  %v906_v48 = vmul.f32 0.7978846, %v890_v41  ;;  %v876_v50 = vmul.f32 %v860_v44, %v1869_v6 }
 0x172   : > { %v931_v27 = vadd.f32 1.0, %v1436_v43  ;;  %v1913_v54 = vadd.f32 %v812_v39, %v1807_v14  ;;  %v907_v60 = vmul.f32 0.7978846, %v891_v49  ;;  %v847_v0 = vmul.f32 0.044715, %v1905_v45 }
 0x173   : > { %v814_v46 = vpop.f32.mrf.mxu1  ;;  %1449 = vtanh.f32 %v906_v48  ;;  %v862_v7 = vmul.f32 %v846_v52, %v1894_v37  ;;  %v892_v9 = vadd.f32 %v876_v50, %v1869_v6  ;;  %v877_v11 = vmul.f32 %v861_v63, %v1884_v25 }
 0x174   : > { %v1438_v51 = vpop.eup %1437  ;;  %v947_v57 = vmul.f32 %v931_v27, %v819_v26  ;;  %v1921_v1 = vadd.f32 %v814_v46, %v1804_v13  ;;  %1451 = vtanh.f32 %v907_v60  ;;  %v848_v8 = vmul.f32 0.044715, %v1913_v54 }
 0x175   : > { %v932_v58 = vadd.f32 1.0, %v1438_v51  ;;  %v816_v33 = vpop.f32.mrf.mxu1  ;;  %v863_v20 = vmul.f32 %v847_v0, %v1905_v45  ;;  %v825_v51 = vmul.f32 0.5, %v1846_v47  ;;  %v826_v60 = vmul.f32 0.5, %v1855_v55 }
 0x176   : > { %v1440_v62 = vpop.eup %1439  ;;  %v1928_v10 = vadd.f32 %v816_v33, %v1807_v14  ;;  %v963_v17 = vmul.f32 %v947_v57, %v708_v35  ;;  %v849_v26 = vmul.f32 0.044715, %v1921_v1  ;;  %v864_v35 = vmul.f32 %v848_v8, %v1913_v54 }
 0x177   : > { %v948_v3 = vmul.f32 %v932_v58, %v820_v28  ;;  %v933_v4 = vadd.f32 1.0, %v1440_v62  ;;  %v908_v28 = vmul.f32 0.7978846, %v892_v9  ;;  %v879_v27 = vmul.f32 %v863_v20, %v1905_v45  ;;  %v729_v62 = vpop.f32.mrf.mxu0 }
 0x178   : > { %v1442_v5 = vpop.eup %1441  ;;  %v850_v41 = vmul.f32 0.044715, %v1928_v10  ;;  %v865_v43 = vmul.f32 %v849_v26, %v1921_v1  ;;  %v722_v55 = vadd.f32 %v1916_v59, %v1874_v12 }
 0x179   : > { %v964_v13 = vmul.f32 %v948_v3, %v710_v38  ;;  %v949_v18 = vmul.f32 %v933_v4, %v821_v29  ;;  %v934_v21 = vadd.f32 1.0, %v1442_v5  ;;  %v1444_v24 = vpop.eup %1443  ;;  %1453 = vtanh.f32 %v908_v28 }
 0x17a   : > { %v935_v14 = vadd.f32 1.0, %v1444_v24  ;;  %v893_v29 = vadd.f32 %v877_v11, %v1884_v25  ;;  %v878_v38 = vmul.f32 %v862_v7, %v1894_v37  ;;  %v866_v57 = vmul.f32 %v850_v41, %v1928_v10 }
 0x17b   : > { %v1244_v31 = vpack.c.bf16 %v964_v13, %v963_v17  ;;  %v950_v32 = vmul.f32 %v934_v21, %v822_v16  ;;  %v965_v39 = vmul.f32 %v949_v18, %v712_v53  ;;  %v720_v16 = vadd.f32 %v1898_v19, %v1877_v15  ;;  %v731_v21 = vpop.f32.mrf.mxu0 }
 0x17c   : > { %v1446_v42 = vpop.eup %1445  ;;  %v909_v44 = vmul.f32 0.7978846, %v893_v29  ;;  %v894_v30 = vadd.f32 %v878_v38, %v1894_v37  ;;  %v951_v48 = vmul.f32 %v935_v14, %v823_v36  ;;  %v895_v19 = vadd.f32 %v879_v27, %v1905_v45 }
 0x17d   : > { %1027 = vst [vmem:[%s1940_s18] sm:$0xff] %v1244_v31  ;;  %v966_v23 = vmul.f32 %v950_v32, %v714_v56  ;;  %v936_v49 = vadd.f32 1.0, %v1446_v42  ;;  %v880_v56 = vmul.f32 %v864_v35, %v1913_v54  ;;  %v881_v0 = vmul.f32 %v865_v43, %v1921_v1  ;;  %v733_v14 = vpop.f32.mrf.mxu0 }
 0x17e   : > { %v1448_v52 = vpop.eup %1447  ;;  %1455 = vtanh.f32 %v909_v44  ;;  %v910_v53 = vmul.f32 0.7978846, %v894_v30  ;;  %v911_v36 = vmul.f32 0.7978846, %v895_v19  ;;  %v967_v50 = vmul.f32 %v951_v48, %v718_v2 }
 0x17f   : > { %v1245_v46 = vpack.c.bf16 %v966_v23, %v965_v39  ;;  %v952_v58 = vmul.f32 %v936_v49, %v824_v34  ;;  %v937_v33 = vadd.f32 1.0, %v1448_v52  ;;  %v896_v47 = vadd.f32 %v880_v56, %v1913_v54  ;;  %v737_v41 = vpop.f32.mrf.mxu0 }
 0x180   : > { %v1450_v63 = vpop.eup %1449  ;;  %1457 = vtanh.f32 %v910_v53  ;;  %v897_v9 = vadd.f32 %v881_v0, %v1921_v1  ;;  %v724_v13 = vadd.f32 %v723_v22, %v1877_v15  ;;  %v882_v20 = vmul.f32 %v866_v57, %v1928_v10 }
 0x181   : > { %1028 = vst [vmem:[%s1940_s18 + $0x8] sm:$0xff] %v1245_v46  ;;  %v968_v3 = vmul.f32 %v952_v58, %v720_v16  ;;  %v953_v4 = vmul.f32 %v937_v33, %v825_v51  ;;  %v938_v5 = vadd.f32 1.0, %v1450_v63  ;;  %v1452_v7 = vpop.eup %1451  ;;  %1459 = vtanh.f32 %v911_v36  ;;  %v739_v51 = vpop.f32.mrf.mxu0 }
 0x182   : > { %v912_v8 = vmul.f32 0.7978846, %v896_v47  ;;  %v939_v24 = vadd.f32 1.0, %v1452_v7  ;;  %v913_v2 = vmul.f32 0.7978846, %v897_v9  ;;  %v827_v11 = vmul.f32 0.5, %v1861_v61 }
 0x183   : > { %v1246_v17 = vpack.c.bf16 %v968_v3, %v967_v50  ;;  %v954_v18 = vmul.f32 %v938_v5, %v826_v60  ;;  %v969_v26 = vmul.f32 %v953_v4, %v722_v55  ;;  %v898_v31 = vadd.f32 %v882_v20, %v1928_v10  ;;  %v741_v36 = vpop.f32.mrf.mxu0 }
 0x184   : > { %1461 = vtanh.f32 %v912_v8  ;;  %v728_v22 = vadd.f32 %v727_v40, %v1874_v12  ;;  %v955_v34 = vmul.f32 %v939_v24, %v827_v11  ;;  %v828_v35 = vmul.f32 0.5, %v1869_v6 }
 0x185   : > { %1029 = vst [vmem:[%s1940_s18 + $0x10] sm:$0xff] %v1246_v17  ;;  %v970_v28 = vmul.f32 %v954_v18, %v724_v13  ;;  %1463 = vtanh.f32 %v913_v2  ;;  %v914_v38 = vmul.f32 0.7978846, %v898_v31  ;;  %v730_v39 = vadd.f32 %v729_v62, %v1877_v15  ;;  %v743_v7 = vpop.f32.mrf.mxu0 }
 0x186   : > { %v1454_v32 = vpop.eup %1453  ;;  %v971_v16 = vmul.f32 %v955_v34, %v728_v22  ;;  %v829_v43 = vmul.f32 0.5, %v1884_v25  ;;  %v830_v6 = vmul.f32 0.5, %v1894_v37  ;;  %v732_v49 = vadd.f32 %v731_v21, %v1874_v12 }
 0x187   : > { %v1247_v59 = vpack.c.bf16 %v970_v28, %v969_v26  ;;  %v940_v29 = vadd.f32 1.0, %v1454_v32  ;;  %1465 = vtanh.f32 %v914_v38  ;;  %v734_v52 = vadd.f32 %v733_v14, %v1877_v15 }
 0x188   : > { %v831_v19 = vmul.f32 0.5, %v1905_v45  ;;  %v738_v57 = vadd.f32 %v737_v41, %v1874_v12  ;;  %v832_v58 = vmul.f32 0.5, %v1913_v54  ;;  %v740_v0 = vadd.f32 %v739_v51, %v1877_v15 }
 0x189   : > { %1030 = vst [vmem:[%s1940_s18 + $0x18] sm:$0xff] %v1247_v59  ;;  %v956_v23 = vmul.f32 %v940_v29, %v828_v35  ;;  %v833_v5 = vmul.f32 0.5, %v1921_v1  ;;  %v834_v17 = vmul.f32 0.5, %v1928_v10  ;;  %v742_v13 = vadd.f32 %v741_v36, %v1874_v12 }
 0x18a   : > { %v744_v18 = vadd.f32 %v743_v7, %v1877_v15 }
 0x18b   : > { %v1456_v61 = vpop.eup %1455  ;;  %v972_v42 = vmul.f32 %v956_v23, %v730_v39 }
 0x18c   : > { %v941_v44 = vadd.f32 1.0, %v1456_v61 }
 0x18d   : > { %v1458_v40 = vpop.eup %1457  ;;  %v1248_v30 = vpack.c.bf16 %v972_v42, %v971_v16 }
 0x18e   : > { %v957_v27 = vmul.f32 %v941_v44, %v829_v43  ;;  %v942_v46 = vadd.f32 1.0, %v1458_v40  ;;  %v1460_v48 = vpop.eup %1459 }
 0x18f   : > { %1031 = vst [vmem:[%s1940_s18 + $0x20] sm:$0xff] %v1248_v30  ;;  %v943_v56 = vadd.f32 1.0, %v1460_v48 }
 0x190   : > { %v958_v53 = vmul.f32 %v942_v46, %v830_v6  ;;  %v973_v33 = vmul.f32 %v957_v27, %v732_v49 }
 0x191   : > { %v1462_v25 = vpop.eup %1461  ;;  %v959_v60 = vmul.f32 %v943_v56, %v831_v19 }
 0x192   : > { %v974_v37 = vmul.f32 %v958_v53, %v734_v52  ;;  %v944_v62 = vadd.f32 1.0, %v1462_v25  ;;  %v1464_v63 = vpop.eup %1463 }
 0x193   : > { %v945_v3 = vadd.f32 1.0, %v1464_v63  ;;  %v975_v45 = vmul.f32 %v959_v60, %v738_v57 }
 0x194   : > { %v1249_v47 = vpack.c.bf16 %v974_v37, %v973_v33  ;;  %v960_v50 = vmul.f32 %v944_v62, %v832_v58  ;;  %v1466_v54 = vpop.eup %1465 }
 0x195   : > { %v961_v9 = vmul.f32 %v945_v3, %v833_v5  ;;  %v946_v55 = vadd.f32 1.0, %v1466_v54 }
 0x196   : > { %1032 = vst [vmem:[%s1940_s18 + $0x28] sm:$0xff] %v1249_v47  ;;  %v976_v4 = vmul.f32 %v960_v50, %v740_v0 }
 0x197   : > { %v962_v21 = vmul.f32 %v946_v55, %v834_v17  ;;  %v977_v24 = vmul.f32 %v961_v9, %v742_v13 }
 0x198   : > { %v1250_v8 = vpack.c.bf16 %v976_v4, %v975_v45 }
 0x199   : > { %v978_v1 = vmul.f32 %v962_v21, %v744_v18 }
 0x19a   : > { %1033 = vst [vmem:[%s1940_s18 + $0x30] sm:$0xff] %v1250_v8 }
 0x19b   : > { %v1251_v10 = vpack.c.bf16 %v978_v1, %v977_v24 }
 0x19d   : > { %1034 = vst [vmem:[%s1940_s18 + $0x38] sm:$0xff] %v1251_v10 }
 0x19e   : > { %1560 = shalt.err (!%p1557_p9)
}
 0x19f   : > { %s1561_s22 = scalar_lea.hbm %s1989_s29, 1024  ;;  %s1565_s26 = scalar_lea.hbm %s2037_s3, 4096 }
 0x1a0   : > { %p1562_p12 = scmp.ne.s32.totalorder %s1989_s29, %s1561_s22  ;;  %p1566_p4 = scmp.lt.s32.totalorder %s1989_s29, %s2037_s3 }
 0x1a1   : > { %p1567_p8 = scmp.lt.s32.totalorder %s1565_s26, %s1561_s22 }
 0x1a2   : > { %p1563_p3 = pnand %p1562_p12, %p2053_p0 }
 0x1a3   : > { %p1568_p5 = por %p1567_p8, %p1566_p4 }
 0x1a4   : > { %p1564_p13 = pneg %p1563_p3 }
 0x1a6   : > { %p1569_p10 = pnand %p1568_p5, %p1564_p13 }
 0x1a8   : > { %1572 = shalt.err (!%p1569_p10)
}
 0x1a9   : > { %s1625_s6 = smov 128   ;;  %s1626_s18 = smov 8  }
 0x1aa   : > { %1264 = dma.vmem_to_hbm [thread:$0]  (%p2053_p0), %s1991_s25, 1024, %s1989_s29, %s1036_s8, %s1625_s6, %s1625_s6, %s1626_s18  }
 0x1ab PF: > { %p1286_p1 = scmp.ge.s32.totalorder %s1615_s15, 2  ;;  %s1065_s20 = sand.u32 1, %s1603_s12  }
 0x1ac   : > { %p2054_p2 = scmp.ne.s32.totalorder %s2043_s19, 0  ;;  %s1066_s27 = scalar_lea.sflag [#allocation4], %s1065_s20 }
 0x1ae   : > { %p1278_p6 = pnand %p1286_p1, %p2054_p2 }
 0x1b0   : > { %p1279_p11 = pneg %p1278_p6 }
 0x1b2   : > { %1598 = dma.done.wait (%p1279_p11), %s1066_s27, 1024  }
 0x1b3   : > { %1600 = vsyncadd (%p1279_p11), %s1066_s27, 4294966272  ;;  %p17_p7 = scmp.ge.s32.totalorder %s1718_s7, 6   ;;  %s2055_s12 = smov %s1607_s13 }
 0x1b4   : > { %s2056_s13 = smov %s1611_s14  ;;  %s2057_s14 = smov %s1734_s11 }
 0x1b5   : > { %s2058_s15 = smov %s1718_s7  ;;  %19 = sbr.rel (!%p17_p7) target bundleno = 6 (0x6), region = 85 }
 0x1ba   :  { %1071 = vsyncpa [#allocation3], 1 }
 0x1bb   :  { %1073 = vsyncpa [#allocation3 + $0x1], 1 }
 0x1bc   :  { %1074 = vsyncpa [#allocation6], 1 }
 0x1bd   :  { %1075 = vsyncpa [#allocation4], 1 }
 0x1be   :  { %1077 = vsyncpa [#allocation4 + $0x1], 1 }

</bundles_post_ra>
